<compile_context>
chip_gen: v7x
topology: tpu7x:2x2x1
jax: 0.10.0
libtpu: 0.0.40
codegen_flags: <defaults>
</compile_context>

<pallas_src>
import functools

import jax
import jax.numpy as jnp
from jax.experimental import pallas as pl
from jax.experimental.pallas import tpu as pltpu


def fp_kernel(k, nbits,
              pos_skip_ref,          # (TILE_M, 3)        f32  skip coords of this tile
              x_skip_ref,            # (TILE_M, C_skip)   f32  skip features of this tile
              pos_src_t_ref,         # (3, N_B)           f32  source coords of this batch (transposed)
              xw1a_ref,              # (N_B, H_pad)       bf16 precomputed x @ W1[:C_in] of this batch
              w1b_ref,               # (C_skip, H_pad)    bf16
              b1_ref,                # (1, H_pad)         f32
              w2_ref,                # (H_pad, C_pad)     bf16
              b2_ref,                # (1, C_pad)         f32
              out_ref):              # (TILE_M, C_pad)    f32
    f32 = jnp.float32
    bf16 = jnp.bfloat16

    pos_skip = pos_skip_ref[...]                                        # (TM, 3)
    pos_src_t = pos_src_t_ref[...]                                      # (3, NB)
    tm = pos_skip.shape[0]
    nb = pos_src_t.shape[1]

    # ---- pairwise squared distances via the MXU (|a|^2 + |b|^2 - 2 a.b), f32 ----
    a_sq = jnp.sum(pos_skip * pos_skip, axis=1, keepdims=True)          # (TM, 1)
    b_sq = jnp.sum(pos_src_t * pos_src_t, axis=0, keepdims=True)        # (1, NB)
    cross = jnp.dot(pos_skip, pos_src_t, preferred_element_type=f32)
    d2 = jnp.maximum(a_sq + b_sq - 2.0 * cross, 0.0)                    # (TM, NB), >= 0

    # ---- fused value+index packing: one int32 lane-min per arg-min iteration ----
    # d2 >= 0, so its int32 bit pattern is order-preserving. Replace the low `nbits`
    # mantissa bits by the column index: the min carries both the (slightly truncated)
    # min distance and the first-occurrence arg-min column.
    col = jax.lax.broadcasted_iota(jnp.int32, (tm, nb), 1)
    low_mask = jnp.int32((1 << nbits) - 1)
    high_mask = jnp.int32(-(1 << nbits))
    packed = (pltpu.bitcast(d2, jnp.int32) & high_mask) | col           # (TM, NB) int32
    BIG_PACKED = jnp.int32(0x7F000000)  # larger than any finite packed distance of interest

    wmat = jnp.zeros((tm, nb), f32)
    wsum = jnp.zeros((tm, 1), f32)
    for _ in range(k):
        pmin = jnp.min(packed, axis=1, keepdims=True)                   # one XLU row-reduce
        sel = pmin & low_mask                                           # arg-min column
        minval = pltpu.bitcast(pmin & high_mask, f32)                   # truncated min distance
        w = pl.reciprocal(jnp.maximum(minval, 1e-16), approx=True)      # EUP, (TM, 1)
        hit = col == sel                                                # (TM, NB) one-hot mask
        wmat = wmat + hit.astype(f32) * w                               # FMA, no select
        wsum = wsum + w
        packed = jnp.where(hit, BIG_PACKED, packed)                     # drop chosen neighbor

    # ---- row-normalize in f32, then bf16 operands with f32 accumulation ----------
    # interp @ W1a == (wmat / wsum) @ (x @ W1a)
    wmat_n = (wmat * pl.reciprocal(wsum, approx=True)).astype(bf16)     # rows sum to ~1
    interp_h = jnp.dot(wmat_n, xw1a_ref[...], preferred_element_type=f32)          # (TM, H_pad)
    h = (interp_h
         + jnp.dot(x_skip_ref[...].astype(bf16), w1b_ref[...], preferred_element_type=f32)
         + b1_ref[...])
    h = jnp.maximum(h, 0.0).astype(bf16)
    o = jnp.dot(h, w2_ref[...], preferred_element_type=f32) + b2_ref[...]
    out_ref[...] = jnp.maximum(o, 0.0)


def _vmem_limit_bytes():
    """~3/4 of physical VMEM, capped at 96 MiB (v5e/v6e: 128 MiB, v7x: 64 MiB/TC)."""
    try:
        cap = int(pltpu.get_tpu_info().vmem_capacity_bytes)
    except Exception:
        cap = 64 << 20  # conservative (v7x per-TensorCore)
    return min((cap * 3) // 4, 96 << 20)


def _choose_tile_m(m_b, n_b, c_skip, h_pad, c_pad, vmem_limit_bytes, num_batches):
    """Largest skip tile (multiple of 8) whose full VMEM working set fits the budget."""
    # Tile-independent resident VMEM: double-buffered per-batch blocks + weights.
    fixed = (2 * n_b * h_pad * 2              # xw1a (bf16), double-buffered
             + 2 * 3 * n_b * 4                # pos_src^T (f32), double-buffered
             + 2 * (c_skip * h_pad * 2 + h_pad * c_pad * 2)   # w1b / w2 (bf16)
             + 2 * (h_pad + c_pad) * 4)       # biases (f32)
    budget = vmem_limit_bytes - fixed - (4 << 20)   # headroom for compiler scratch
    # Per-skip-row VMEM cost while the kernel runs.
    per_row = (5 * n_b * 4                    # ~5 live (tile, N_B) 32-bit slabs (k-NN loop)
               + 2 * 3 * 4 + 2 * c_skip * 4   # double-buffered pos_skip / x_skip (f32)
               + 2 * c_pad * 4                # double-buffered f32 output tile
               + 3 * h_pad * 4 + c_pad * 4)   # MLP temporaries
    cap = max(8, budget // per_row) if budget > 0 else 8
    cap = min(cap, 1024, m_b)
    if m_b <= 8:
        return m_b                            # full axis: always a legal block
    tile = max(8, (cap // 8) * 8)
    # v7x megacore: keep at least 2 grid tiles so both TensorCores get work.
    if num_batches * (-(-m_b // tile)) < 2:
        tile = max(8, ((m_b // 2 + 7) // 8) * 8)
    return min(tile, m_b)


def fp_module_pallas(x, pos, batch, x_skip, pos_skip, batch_skip,
                     w1, b1, w2, b2, *, k, num_batches):
    """Forward of FPModule. Returns (features, pos_skip, batch_skip).

    Assumes the PyG convention: batch ids contiguous & sorted, equal-size point clouds
    (true for this model: fixed-size clouds + fixed sampling ratios).
    """
    # TODO(synk): ragged (unequal) batch sizes need per-batch padding + scalar-prefetch
    #             row offsets; very large N_src would add an inner "arbitrary" grid axis
    #             with an online running-k-best instead of a full (TILE_M, N_B) slab.
    N_src, C_in = x.shape
    M, C_skip = x_skip.shape
    H = w1.shape[1]
    C_out = w2.shape[1]
    B = int(num_batches)
    assert N_src % B == 0 and M % B == 0, "contiguous equal-size batches assumed"
    n_b, m_b = N_src // B, M // B
    assert n_b >= k, "need at least k source points per batch"

    f32, bf16 = jnp.float32, jnp.bfloat16
    h_pad = ((H + 127) // 128) * 128
    c_pad = ((C_out + 127) // 128) * 128

    # Fold the interpolation through W1's top block once (f32), then cast to bf16.
    xw1a = jnp.dot(x.astype(f32), w1[:C_in, :].astype(f32))             # (N_src, H)
    xw1a_p = jnp.zeros((N_src, h_pad), bf16).at[:, :H].set(xw1a.astype(bf16))
    w1b_p = jnp.zeros((C_skip, h_pad), bf16).at[:, :H].set(w1[C_in:, :].astype(bf16))
    b1_p = jnp.zeros((1, h_pad), f32).at[0, :H].set(b1.astype(f32))
    w2_p = jnp.zeros((h_pad, c_pad), bf16).at[:H, :C_out].set(w2.astype(bf16))
    b2_p = jnp.zeros((1, c_pad), f32).at[0, :C_out].set(b2.astype(f32))

    vmem_limit = _vmem_limit_bytes()
    tile_m = _choose_tile_m(m_b, n_b, C_skip, h_pad, c_pad, vmem_limit, B)
    n_j = -(-m_b // tile_m)
    m_pad = n_j * tile_m

    # Batch-major reshapes (contiguous equal batches) + skip-side pad to tile multiple.
    pos_skip_b = pos_skip.astype(f32).reshape(B, m_b, 3)
    x_skip_b = x_skip.astype(f32).reshape(B, m_b, C_skip)
    if m_pad != m_b:
        pos_skip_b = jnp.pad(pos_skip_b, ((0, 0), (0, m_pad - m_b), (0, 0)))
        x_skip_b = jnp.pad(x_skip_b, ((0, 0), (0, m_pad - m_b), (0, 0)))
    pos_src_t_b = pos.astype(f32).T.reshape(3, B, n_b).transpose(1, 0, 2)  # (B, 3, n_b)
    xw1a_b = xw1a_p.reshape(B, n_b, h_pad)

    nbits = max(1, (n_b - 1).bit_length())
    grid = (B, n_j)

    out = pl.pallas_call(
        functools.partial(fp_kernel, k, nbits),
        out_shape=jax.ShapeDtypeStruct((B, m_pad, c_pad), f32),
        grid_spec=pltpu.PrefetchScalarGridSpec(
            num_scalar_prefetch=0,
            grid=grid,
            in_specs=[
                # per-skip-tile blocks
                pl.BlockSpec((None, tile_m, 3), lambda b, j: (b, j, 0)),
                pl.BlockSpec((None, tile_m, C_skip), lambda b, j: (b, j, 0)),
                # per-batch (resident across j) source blocks
                pl.BlockSpec((None, 3, n_b), lambda b, j: (b, 0, 0)),
                pl.BlockSpec((None, n_b, h_pad), lambda b, j: (b, 0, 0)),
                # resident weights
                pl.BlockSpec((C_skip, h_pad), lambda b, j: (0, 0)),
                pl.BlockSpec((1, h_pad), lambda b, j: (0, 0)),
                pl.BlockSpec((h_pad, c_pad), lambda b, j: (0, 0)),
                pl.BlockSpec((1, c_pad), lambda b, j: (0, 0)),
            ],
            out_specs=pl.BlockSpec((None, tile_m, c_pad), lambda b, j: (b, j, 0)),
        ),
        compiler_params=pltpu.CompilerParams(
            dimension_semantics=("parallel", "parallel"),   # megacore sharding on v7x
            vmem_limit_bytes=vmem_limit,
        ),
    )(pos_skip_b, x_skip_b, pos_src_t_b, xw1a_b, w1b_p, b1_p, w2_p, b2_p)

    feats = out[:, :m_b, :C_out].reshape(M, C_out)
    return feats, pos_skip, batch_skip


# ------------------------- pure-JAX reference --------------------------------
def _ref_forward(x, pos, batch, x_skip, pos_skip, batch_skip, w1, b1, w2, b2, k):
    d2 = jnp.sum((pos_skip[:, None, :] - pos[None, :, :]) ** 2, axis=-1)
    d2 = jnp.where(batch_skip[:, None] == batch[None, :], d2, jnp.inf)
    neg_top, idx = jax.lax.top_k(-d2, k)
    dist = -neg_top
    w = 1.0 / jnp.maximum(dist, 1e-16)
    feats = x[idx]                                            # (M, k, C_in)
    interp = jnp.sum(feats * w[..., None], axis=1) / jnp.sum(w, axis=1, keepdims=True)
    cat = jnp.concatenate([interp, x_skip], axis=1)
    h = jnp.maximum(cat @ w1 + b1, 0.0)
    return jnp.maximum(h @ w2 + b2, 0.0)


if __name__ == "__main__":
    key = jax.random.PRNGKey(0)
    ks = jax.random.split(key, 8)

    K = 3
    NUM_BATCHES = 2
    N_SRC, N_SKIP = 16, 32        # 2 batches: 8 src / 16 skip points each
    C_IN, C_SKIP = 8, 4
    HIDDEN, C_OUT = 32, 16

    x = jax.random.normal(ks[0], (N_SRC, C_IN), jnp.float32)
    pos = jax.random.normal(ks[1], (N_SRC, 3), jnp.float32)
    x_skip = jax.random.normal(ks[2], (N_SKIP, C_SKIP), jnp.float32)
    pos_skip = jax.random.normal(ks[3], (N_SKIP, 3), jnp.float32)
    batch = jnp.concatenate([jnp.zeros(N_SRC // 2, jnp.int32),
                             jnp.ones(N_SRC // 2, jnp.int32)])
    batch_skip = jnp.concatenate([jnp.zeros(N_SKIP // 2, jnp.int32),
                                  jnp.ones(N_SKIP // 2, jnp.int32)])

    # MLP params (self.nn = Linear(12,32)->ReLU->Linear(32,16)->ReLU)
    w1 = jax.random.normal(ks[4], (C_IN + C_SKIP, HIDDEN), jnp.float32) * 0.1
    b1 = jax.random.normal(ks[5], (HIDDEN,), jnp.float32) * 0.01
    w2 = jax.random.normal(ks[6], (HIDDEN, C_OUT), jnp.float32) * 0.1
    b2 = jax.random.normal(ks[7], (C_OUT,), jnp.float32) * 0.01

    out, out_pos, out_batch = fp_module_pallas(
        x, pos, batch, x_skip, pos_skip, batch_skip, w1, b1, w2, b2,
        k=K, num_batches=NUM_BATCHES)
    jax.block_until_ready(out)

    ref = _ref_forward(x, pos, batch, x_skip, pos_skip, batch_skip, w1, b1, w2, b2, K)
    assert out.shape == (N_SKIP, C_OUT)
    # Tolerance 2e-2: bf16 matmul operands (f32 accumulation), approximate EUP
    # reciprocals, and the MXU-form distance reassociate/round f32 summations
    # relative to the pure-f32 reference.
    assert jnp.allclose(out, ref, atol=2e-2, rtol=2e-2), "mismatch vs reference"
    print("KERNEL_OK")
</pallas_src>

<mosaic_0001>
module attributes {stable_mosaic.version = 11 : i64} {
  func.func @fp_kernel(%arg0: i32, %arg1: i32, %arg2: memref<1x16x3xf32, #tpu.memory_space<vmem>>, %arg3: memref<1x16x4xf32, #tpu.memory_space<vmem>>, %arg4: memref<1x3x8xf32, #tpu.memory_space<vmem>>, %arg5: memref<1x8x128xbf16, #tpu.memory_space<vmem>>, %arg6: memref<4x128xbf16, #tpu.memory_space<vmem>>, %arg7: memref<1x128xf32, #tpu.memory_space<vmem>>, %arg8: memref<128x128xbf16, #tpu.memory_space<vmem>>, %arg9: memref<1x128xf32, #tpu.memory_space<vmem>>, %arg10: memref<1x16x128xf32, #tpu.memory_space<vmem>>) attributes {dimension_semantics = [#tpu.dimension_semantics<parallel>, #tpu.dimension_semantics<parallel>], iteration_bounds = array<i64: 2, 1>, scalar_prefetch = 0 : i64, scratch_operands = 0 : i64, tpu.core_type = #tpu.core_type<tc>, window_params = [{transform_indices = @transform_0, window_bounds = array<i64: 1, 16, 3>}, {transform_indices = @transform_1, window_bounds = array<i64: 1, 16, 4>}, {transform_indices = @transform_2, window_bounds = array<i64: 1, 3, 8>}, {transform_indices = @transform_3, window_bounds = array<i64: 1, 8, 128>}, {pipeline_mode = #tpu.pipeline_mode<synchronous>, transform_indices = @transform_4, window_bounds = array<i64: 4, 128>}, {pipeline_mode = #tpu.pipeline_mode<synchronous>, transform_indices = @transform_5, window_bounds = array<i64: 1, 128>}, {pipeline_mode = #tpu.pipeline_mode<synchronous>, transform_indices = @transform_6, window_bounds = array<i64: 128, 128>}, {pipeline_mode = #tpu.pipeline_mode<synchronous>, transform_indices = @transform_7, window_bounds = array<i64: 1, 128>}, {transform_indices = @transform_8, window_bounds = array<i64: 1, 16, 128>}]} {
    %c0 = arith.constant 0 : index
    %c0_0 = arith.constant 0 : index
    %c0_1 = arith.constant 0 : index
    %0 = vector.load %arg2[%c0, %c0_0, %c0_1] : memref<1x16x3xf32, #tpu.memory_space<vmem>>, vector<1x16x3xf32>
    %1 = vector.shape_cast %0 : vector<1x16x3xf32> to vector<16x3xf32>
    %c0_2 = arith.constant 0 : index
    %c0_3 = arith.constant 0 : index
    %c0_4 = arith.constant 0 : index
    %2 = vector.load %arg4[%c0_2, %c0_3, %c0_4] : memref<1x3x8xf32, #tpu.memory_space<vmem>>, vector<1x3x8xf32>
    %3 = vector.shape_cast %2 : vector<1x3x8xf32> to vector<3x8xf32>
    %4 = arith.mulf %1, %1 : vector<16x3xf32>
    %cst = arith.constant dense<0.000000e+00> : vector<16xf32>
    %5 = vector.multi_reduction <add>, %4, %cst [1] : vector<16x3xf32> to vector<16xf32>
    %6 = vector.shape_cast %5 : vector<16xf32> to vector<16x1xf32>
    %7 = arith.mulf %3, %3 : vector<3x8xf32>
    %cst_5 = arith.constant dense<0.000000e+00> : vector<8xf32>
    %8 = vector.multi_reduction <add>, %7, %cst_5 [0] : vector<3x8xf32> to vector<8xf32>
    %9 = vector.shape_cast %8 : vector<8xf32> to vector<1x8xf32>
    %cst_6 = arith.constant dense<0.000000e+00> : vector<16x8xf32>
    %10 = tpu.matmul %1, %3, %cst_6 {dimension_numbers = #tpu.dot_dimension_numbers<[1], [0], [0], [1], [0, 0, 1, 1], [], []>} : vector<16x3xf32>, vector<3x8xf32>, vector<16x8xf32> -> vector<16x8xf32>
    %11 = vector.broadcast %6 : vector<16x1xf32> to vector<16x8xf32>
    %12 = vector.broadcast %9 : vector<1x8xf32> to vector<16x8xf32>
    %13 = arith.addf %11, %12 : vector<16x8xf32>
    %cst_7 = arith.constant 2.000000e+00 : f32
    %14 = vector.broadcast %cst_7 : f32 to vector<16x8xf32>
    %15 = arith.mulf %14, %10 : vector<16x8xf32>
    %16 = arith.subf %13, %15 : vector<16x8xf32>
    %cst_8 = arith.constant 0.000000e+00 : f32
    %17 = vector.broadcast %cst_8 : f32 to vector<16x8xf32>
    %18 = arith.maximumf %16, %17 : vector<16x8xf32>
    %19 = tpu.iota {dimensions = array<i32: 1>} : vector<16x8xi32>
    %20 = tpu.bitcast %18 : vector<16x8xf32> -> vector<16x8xi32>
    %c-8_i32 = arith.constant -8 : i32
    %21 = vector.broadcast %c-8_i32 : i32 to vector<16x8xi32>
    %22 = arith.andi %20, %21 : vector<16x8xi32>
    %23 = arith.ori %22, %19 : vector<16x8xi32>
    %cst_9 = arith.constant 0.000000e+00 : f32
    %24 = vector.broadcast %cst_9 : f32 to vector<16x8xf32>
    %cst_10 = arith.constant 0.000000e+00 : f32
    %25 = vector.broadcast %cst_10 : f32 to vector<16x1xf32>
    %cst_11 = arith.constant dense<2147483647> : vector<16xi32>
    %26 = vector.multi_reduction <minsi>, %23, %cst_11 [1] : vector<16x8xi32> to vector<16xi32>
    %27 = vector.shape_cast %26 : vector<16xi32> to vector<16x1xi32>
    %c7_i32 = arith.constant 7 : i32
    %28 = vector.broadcast %c7_i32 : i32 to vector<16x1xi32>
    %29 = arith.andi %27, %28 : vector<16x1xi32>
    %c-8_i32_12 = arith.constant -8 : i32
    %30 = vector.broadcast %c-8_i32_12 : i32 to vector<16x1xi32>
    %31 = arith.andi %27, %30 : vector<16x1xi32>
    %32 = tpu.bitcast %31 : vector<16x1xi32> -> vector<16x1xf32>
    %cst_13 = arith.constant 1.000000e-16 : f32
    %33 = vector.broadcast %cst_13 : f32 to vector<16x1xf32>
    %34 = arith.maximumf %32, %33 : vector<16x1xf32>
    %35 = tpu.reciprocal %34 {approx = true} : vector<16x1xf32> -> vector<16x1xf32>
    %36 = vector.broadcast %29 : vector<16x1xi32> to vector<16x8xi32>
    %37 = arith.cmpi eq, %19, %36 : vector<16x8xi32>
    %38 = arith.extui %37 : vector<16x8xi1> to vector<16x8xi32>
    %39 = arith.sitofp %38 : vector<16x8xi32> to vector<16x8xf32>
    %40 = vector.broadcast %35 : vector<16x1xf32> to vector<16x8xf32>
    %41 = arith.mulf %39, %40 : vector<16x8xf32>
    %42 = arith.addf %24, %41 : vector<16x8xf32>
    %43 = arith.addf %25, %35 : vector<16x1xf32>
    %c2130706432_i32 = arith.constant 2130706432 : i32
    %44 = vector.broadcast %c2130706432_i32 : i32 to vector<16x8xi32>
    %45 = arith.select %37, %44, %23 : vector<16x8xi1>, vector<16x8xi32>
    %cst_14 = arith.constant dense<2147483647> : vector<16xi32>
    %46 = vector.multi_reduction <minsi>, %45, %cst_14 [1] : vector<16x8xi32> to vector<16xi32>
    %47 = vector.shape_cast %46 : vector<16xi32> to vector<16x1xi32>
    %c7_i32_15 = arith.constant 7 : i32
    %48 = vector.broadcast %c7_i32_15 : i32 to vector<16x1xi32>
    %49 = arith.andi %47, %48 : vector<16x1xi32>
    %c-8_i32_16 = arith.constant -8 : i32
    %50 = vector.broadcast %c-8_i32_16 : i32 to vector<16x1xi32>
    %51 = arith.andi %47, %50 : vector<16x1xi32>
    %52 = tpu.bitcast %51 : vector<16x1xi32> -> vector<16x1xf32>
    %cst_17 = arith.constant 1.000000e-16 : f32
    %53 = vector.broadcast %cst_17 : f32 to vector<16x1xf32>
    %54 = arith.maximumf %52, %53 : vector<16x1xf32>
    %55 = tpu.reciprocal %54 {approx = true} : vector<16x1xf32> -> vector<16x1xf32>
    %56 = vector.broadcast %49 : vector<16x1xi32> to vector<16x8xi32>
    %57 = arith.cmpi eq, %19, %56 : vector<16x8xi32>
    %58 = arith.extui %57 : vector<16x8xi1> to vector<16x8xi32>
    %59 = arith.sitofp %58 : vector<16x8xi32> to vector<16x8xf32>
    %60 = vector.broadcast %55 : vector<16x1xf32> to vector<16x8xf32>
    %61 = arith.mulf %59, %60 : vector<16x8xf32>
    %62 = arith.addf %42, %61 : vector<16x8xf32>
    %63 = arith.addf %43, %55 : vector<16x1xf32>
    %c2130706432_i32_18 = arith.constant 2130706432 : i32
    %64 = vector.broadcast %c2130706432_i32_18 : i32 to vector<16x8xi32>
    %65 = arith.select %57, %64, %45 : vector<16x8xi1>, vector<16x8xi32>
    %cst_19 = arith.constant dense<2147483647> : vector<16xi32>
    %66 = vector.multi_reduction <minsi>, %65, %cst_19 [1] : vector<16x8xi32> to vector<16xi32>
    %67 = vector.shape_cast %66 : vector<16xi32> to vector<16x1xi32>
    %c7_i32_20 = arith.constant 7 : i32
    %68 = vector.broadcast %c7_i32_20 : i32 to vector<16x1xi32>
    %69 = arith.andi %67, %68 : vector<16x1xi32>
    %c-8_i32_21 = arith.constant -8 : i32
    %70 = vector.broadcast %c-8_i32_21 : i32 to vector<16x1xi32>
    %71 = arith.andi %67, %70 : vector<16x1xi32>
    %72 = tpu.bitcast %71 : vector<16x1xi32> -> vector<16x1xf32>
    %cst_22 = arith.constant 1.000000e-16 : f32
    %73 = vector.broadcast %cst_22 : f32 to vector<16x1xf32>
    %74 = arith.maximumf %72, %73 : vector<16x1xf32>
    %75 = tpu.reciprocal %74 {approx = true} : vector<16x1xf32> -> vector<16x1xf32>
    %76 = vector.broadcast %69 : vector<16x1xi32> to vector<16x8xi32>
    %77 = arith.cmpi eq, %19, %76 : vector<16x8xi32>
    %78 = arith.extui %77 : vector<16x8xi1> to vector<16x8xi32>
    %79 = arith.sitofp %78 : vector<16x8xi32> to vector<16x8xf32>
    %80 = vector.broadcast %75 : vector<16x1xf32> to vector<16x8xf32>
    %81 = arith.mulf %79, %80 : vector<16x8xf32>
    %82 = arith.addf %62, %81 : vector<16x8xf32>
    %83 = arith.addf %63, %75 : vector<16x1xf32>
    %84 = tpu.reciprocal %83 {approx = true} : vector<16x1xf32> -> vector<16x1xf32>
    %85 = vector.broadcast %84 : vector<16x1xf32> to vector<16x8xf32>
    %86 = arith.mulf %82, %85 : vector<16x8xf32>
    %87 = arith.truncf %86 : vector<16x8xf32> to vector<16x8xbf16>
    %c0_23 = arith.constant 0 : index
    %c0_24 = arith.constant 0 : index
    %c0_25 = arith.constant 0 : index
    %88 = vector.load %arg5[%c0_23, %c0_24, %c0_25] : memref<1x8x128xbf16, #tpu.memory_space<vmem>>, vector<1x8x128xbf16>
    %89 = vector.shape_cast %88 : vector<1x8x128xbf16> to vector<8x128xbf16>
    %cst_26 = arith.constant dense<0.000000e+00> : vector<16x128xf32>
    %90 = tpu.matmul %87, %89, %cst_26 {dimension_numbers = #tpu.dot_dimension_numbers<[1], [0], [0], [1], [0, 0, 1, 1], [], []>} : vector<16x8xbf16>, vector<8x128xbf16>, vector<16x128xf32> -> vector<16x128xf32>
    %c0_27 = arith.constant 0 : index
    %c0_28 = arith.constant 0 : index
    %c0_29 = arith.constant 0 : index
    %91 = vector.load %arg3[%c0_27, %c0_28, %c0_29] : memref<1x16x4xf32, #tpu.memory_space<vmem>>, vector<1x16x4xf32>
    %92 = vector.shape_cast %91 : vector<1x16x4xf32> to vector<16x4xf32>
    %93 = arith.truncf %92 : vector<16x4xf32> to vector<16x4xbf16>
    %c0_30 = arith.constant 0 : index
    %c0_31 = arith.constant 0 : index
    %94 = vector.load %arg6[%c0_30, %c0_31] : memref<4x128xbf16, #tpu.memory_space<vmem>>, vector<4x128xbf16>
    %cst_32 = arith.constant dense<0.000000e+00> : vector<16x128xf32>
    %95 = tpu.matmul %93, %94, %cst_32 {dimension_numbers = #tpu.dot_dimension_numbers<[1], [0], [0], [1], [0, 0, 1, 1], [], []>} : vector<16x4xbf16>, vector<4x128xbf16>, vector<16x128xf32> -> vector<16x128xf32>
    %96 = arith.addf %90, %95 : vector<16x128xf32>
    %c0_33 = arith.constant 0 : index
    %c0_34 = arith.constant 0 : index
    %97 = vector.load %arg7[%c0_33, %c0_34] : memref<1x128xf32, #tpu.memory_space<vmem>>, vector<1x128xf32>
    %98 = vector.broadcast %97 : vector<1x128xf32> to vector<16x128xf32>
    %99 = arith.addf %96, %98 : vector<16x128xf32>
    %cst_35 = arith.constant 0.000000e+00 : f32
    %100 = vector.broadcast %cst_35 : f32 to vector<16x128xf32>
    %101 = arith.maximumf %99, %100 : vector<16x128xf32>
    %102 = arith.truncf %101 : vector<16x128xf32> to vector<16x128xbf16>
    %c0_36 = arith.constant 0 : index
    %c0_37 = arith.constant 0 : index
    %103 = vector.load %arg8[%c0_36, %c0_37] : memref<128x128xbf16, #tpu.memory_space<vmem>>, vector<128x128xbf16>
    %cst_38 = arith.constant dense<0.000000e+00> : vector<16x128xf32>
    %104 = tpu.matmul %102, %103, %cst_38 {dimension_numbers = #tpu.dot_dimension_numbers<[1], [0], [0], [1], [0, 0, 1, 1], [], []>} : vector<16x128xbf16>, vector<128x128xbf16>, vector<16x128xf32> -> vector<16x128xf32>
    %c0_39 = arith.constant 0 : index
    %c0_40 = arith.constant 0 : index
    %105 = vector.load %arg9[%c0_39, %c0_40] : memref<1x128xf32, #tpu.memory_space<vmem>>, vector<1x128xf32>
    %106 = vector.broadcast %105 : vector<1x128xf32> to vector<16x128xf32>
    %107 = arith.addf %104, %106 : vector<16x128xf32>
    %cst_41 = arith.constant 0.000000e+00 : f32
    %108 = vector.broadcast %cst_41 : f32 to vector<16x128xf32>
    %109 = arith.maximumf %107, %108 : vector<16x128xf32>
    %c0_42 = arith.constant 0 : index
    %c0_43 = arith.constant 0 : index
    %c0_44 = arith.constant 0 : index
    %110 = vector.load %arg10[%c0_42, %c0_43, %c0_44] : memref<1x16x128xf32, #tpu.memory_space<vmem>>, vector<1x16x128xf32>
    %111 = vector.shape_cast %110 : vector<1x16x128xf32> to vector<16x128xf32>
    %112 = vector.shape_cast %109 : vector<16x128xf32> to vector<1x16x128xf32>
    tpu.vector_store %arg10[%c0_42, %c0_43, %c0_44], %112 {strides = array<i32>} : memref<1x16x128xf32, #tpu.memory_space<vmem>>, vector<1x16x128xf32>,
    return
  }
  func.func @transform_0(%arg0: i32, %arg1: i32) -> (i32, i32, i32) {
    %c0_i32 = arith.constant 0 : i32
    %c0_i32_0 = arith.constant 0 : i32
    return %arg0, %arg1, %c0_i32 : i32, i32, i32
  }
  func.func @transform_1(%arg0: i32, %arg1: i32) -> (i32, i32, i32) {
    %c0_i32 = arith.constant 0 : i32
    %c0_i32_0 = arith.constant 0 : i32
    return %arg0, %arg1, %c0_i32 : i32, i32, i32
  }
  func.func @transform_2(%arg0: i32, %arg1: i32) -> (i32, i32, i32) {
    %c0_i32 = arith.constant 0 : i32
    %c0_i32_0 = arith.constant 0 : i32
    %c0_i32_1 = arith.constant 0 : i32
    return %arg0, %c0_i32, %c0_i32_0 : i32, i32, i32
  }
  func.func @transform_3(%arg0: i32, %arg1: i32) -> (i32, i32, i32) {
    %c0_i32 = arith.constant 0 : i32
    %c0_i32_0 = arith.constant 0 : i32
    %c0_i32_1 = arith.constant 0 : i32
    return %arg0, %c0_i32, %c0_i32_0 : i32, i32, i32
  }
  func.func @transform_4(%arg0: i32, %arg1: i32) -> (i32, i32) {
    %c0_i32 = arith.constant 0 : i32
    %c0_i32_0 = arith.constant 0 : i32
    %c0_i32_1 = arith.constant 0 : i32
    return %c0_i32, %c0_i32_0 : i32, i32
  }
  func.func @transform_5(%arg0: i32, %arg1: i32) -> (i32, i32) {
    %c0_i32 = arith.constant 0 : i32
    %c0_i32_0 = arith.constant 0 : i32
    %c0_i32_1 = arith.constant 0 : i32
    return %c0_i32, %c0_i32_0 : i32, i32
  }
  func.func @transform_6(%arg0: i32, %arg1: i32) -> (i32, i32) {
    %c0_i32 = arith.constant 0 : i32
    %c0_i32_0 = arith.constant 0 : i32
    %c0_i32_1 = arith.constant 0 : i32
    return %c0_i32, %c0_i32_0 : i32, i32
  }
  func.func @transform_7(%arg0: i32, %arg1: i32) -> (i32, i32) {
    %c0_i32 = arith.constant 0 : i32
    %c0_i32_0 = arith.constant 0 : i32
    %c0_i32_1 = arith.constant 0 : i32
    return %c0_i32, %c0_i32_0 : i32, i32
  }
  func.func @transform_8(%arg0: i32, %arg1: i32) -> (i32, i32, i32) {
    %c0_i32 = arith.constant 0 : i32
    %c0_i32_0 = arith.constant 0 : i32
    return %arg0, %arg1, %c0_i32 : i32, i32, i32
  }
}

</mosaic_0001>

<bundles_post_ra>
// kernel: tpu_custom_call.1
= control target key start
LH: loop header
LB: loop body
LE: loop exit
PB: predicated region body
PF: predicated region fallthrough
CT: control target
= control target key end

     0   :  { %13 = vsyncpa [#allocation3], 0  ;;  %s1605_s0 = inlined_call_operand.vmem [shape: f32[2,16,3], index: 0, kind: input, shape index: {}]   ;;  %s1606_s1 = inlined_call_operand.vmem [shape: f32[2,16,4], index: 1, kind: input, shape index: {}]   ;;  %s1607_s2 = inlined_call_operand.vmem [shape: f32[2,3,8], index: 2, kind: input, shape index: {}]   ;;  %s1608_s3 = inlined_call_operand.vmem [shape: bf16[2,8,128], index: 3, kind: input, shape index: {}]   ;;  %s1609_s4 = inlined_call_operand.vmem [shape: bf16[4,128], index: 4, kind: input, shape index: {}]   ;;  %s1610_s5 = inlined_call_operand.vmem [shape: f32[1,128], index: 5, kind: input, shape index: {}]   ;;  %s1611_s6 = inlined_call_operand.vmem [shape: bf16[128,128], index: 6, kind: input, shape index: {}]   ;;  %s1612_s7 = inlined_call_operand.vmem [shape: f32[1,128], index: 7, kind: input, shape index: {}]   ;;  %s1613_s8 = inlined_call_operand.hbm [shape: f32[2,16,128], index: 8, kind: output, shape index: {}]  }
   0x1   :  { %15 = vsyncpa [#allocation3 + $0x1], 0  ;;  %s1368_s27 = smov 0   ;;  %s1370_s28 = smov 0  }
   0x2   :  { %s1372_s29 = smov 0   ;;  %s1374_s30 = smov 0  }
   0x3   :  { %s1376_s9 = smov 0   ;;  %s1378_s10 = smov 0  }
   0x4 LB: > { %s1061_s11 = sadd.s32 4294967295, %s1316_s10   ;;  %s1062_s12 = sadd.s32 4294967294, %s1316_s10   ;;  %s1316_s10 = sphi %s1378_s10, %s21_s10   ;;  %s1312_s9 = sphi %s1376_s9, %s1624_s9   ;;  %s1308_s30 = sphi %s1374_s30, %s1623_s30   ;;  %s1304_s29 = sphi %s1372_s29, %s1622_s29   ;;  %s1300_s28 = sphi %s1370_s28, %s1621_s28   ;;  %s1296_s27 = sphi %s1368_s27, %s1620_s27  }
   0x5   : > { %s33_s13 = sadd.s32 1, %s1312_s9  ;;  %s234_s14 = sadd.s32 1, %s1304_s29 }
   0x6   : > { %p35_p0 = scmp.ge.s32.totalorder %s33_s13, 2  ;;  %p244_p1 = scmp.ne.s32.totalorder %s1304_s29, %s1300_s28 }
   0x7   : > { %p245_p2 = scmp.eq.s32.totalorder %s1061_s11, 1  ;;  %p250_p3 = scmp.ne.s32.totalorder %s1300_s28, %s1296_s27 }
   0x8   : > { %s1626_s13 = smov (%p35_p0, %s33_s13), 0  ;;  %p251_p5 = scmp.eq.s32.totalorder %s1062_s12, 1 }
   0x9   : > { %p1408_p4 = por %p245_p2, %p244_p1  ;;  %s229_s16 = ssub.s32 %s1312_s9, %s1626_s13 }
   0xa   : > { %p1065_p6 = scmp.ge.s32.totalorder %s1316_s10, 1  ;;  %p232_p7 = scmp.eq.s32.totalorder %s229_s16, 0 }
   0xb   : > { %p1415_p8 = por %p251_p5, %p250_p3  ;;  %p321_p9 = scmp.lt.s32.totalorder %s1316_s10, 3 }
   0xc   : > { %s1421_s18 = scalar_select %p232_p7, %s1304_s29, %s234_s14  }
   0xd   : > { %p322_p10 = pnand %p1065_p6, %p321_p9 }
   0xe   : > { %p377_p11 = scmp.lt.s32.totalorder (!%p322_p10), %s1308_s30, 1  ;;  %vm433_vm0 = vcmask (!%p322_p10), 1042432   ;;  %vm411_vm1 = vcmask (!%p322_p10), 23552   ;;  %vm419_vm2 = vcmask (!%p322_p10), 59392   ;;  %v520_v22 = vlaneseq (!%p322_p10)  ;;  %s1101_s26 = sshll.u32 (!%p322_p10), %s1308_s30, 8 }
   0xf   : > { %325 = sbr.rel (%p322_p10) target bundleno = 1636 (0x664), region = 52  ;;  %vm528_vm3 = vcmask (!%p322_p10), 64512   ;;  %v1318_v47 = vmov (!%p322_p10), 0.0   ;;  %vm703_vm14 = vcmask (!%p322_p10), 1041408   ;;  %vm1319_vm15 = vmmov (!%p322_p10), 0   ;;  %s1557_s14 = scalar_lea.hbm (!%p322_p10), %s1613_s8, %s1101_s26 }
  0x10   : > { %v1443_v27 = vand.u32 (!%p322_p10), 127, %v520_v22  ;;  %1135 = vmatprep.subr.bf16.mxu1 (!%p322_p10), %v1318_v47  ;;  %1151 = vmatprep.mubr.msk.bf16.mxu1 (!%p322_p10), %vm1319_vm15, %v1318_v47 }
  0x16   : > { %s1425_s19 = scalar_select %p377_p11, %s1308_s30, 1 }
  0x18   : > { %s1071_s20 = sshll.u32 %s1425_s19, 2  ;;  %s1099_s21 = sshll.u32 %s1425_s19, 4 }
  0x19   : > { %s399_s24 = scalar_lea.vmem %s1607_s2, %s1071_s20  ;;  %s384_s11 = scalar_lea.vmem %s1605_s0, %s1099_s21 }
  0x1a   : > { %v408_v0 = vld [vmem:[%s399_s24] sm:$0x7]  ;;  %v407_v2 = vld [vmem:[%s384_s11 + $0x8] sm:$0xff]  ;;  %s394_s16 = scalar_lea.vmem %s1606_s1, %s1099_s21  ;;  %s403_s25 = scalar_lea.vmem %s1608_s3, %s1071_s20 }
  0x1b   : > { %1118 = vmatprep.subr.msk.mxu0 %vm433_vm0, %v408_v0  ;;  %v406_v1 = vld [vmem:[%s384_s11] sm:$0xff]  ;;  %v410_v4 = vmul.f32 %v407_v2, %v407_v2  ;;  %v418_v7 = vmul.f32 %v408_v0, %v408_v0  ;;  %s1320_s20 = smov [#allocation2]  }
  0x1c   : > { %1119 = vmatpush3.msk.msra.mxu0 %vm433_vm0, %v408_v0  ;;  %v409_v3 = vmul.f32 %v406_v1, %v406_v1  ;;  %1120 = vmatprep.mubr.msk.f32.mxu0 %vm411_vm1, %v406_v1  ;;  %vm699_vm0 = vcmask 31744  }
  0x1d   : > { %1121 = vmatmul.mubr.msk.f32.vlgmr.msra.gmra.mrb[0].mxu0 %vm411_vm1, %v407_v2  ;;  %v415_v6 = vsel %vm411_vm1, %v410_v4, 0.0  ;;  %v420_v8 = vsel %vm419_vm2, %v418_v7, 0.0  ;;  %1123 = vmatprep.subr.bf16.mxu0 %v1318_v47 }
  0x1e   : > { %v412_v5 = vsel %vm411_vm1, %v409_v3, 0.0  ;;  %v421_v9 = vrot.slane %v420_v8, 4  ;;  %1125 = vmatprep.mubr.msk.bf16.mxu0 %vm1319_vm15, %v1318_v47  ;;  %vm751_vm1 = vcmask 1043456  }
  0x1f   : > { %413 = vadd.xlane.f32.xlu0 %v412_v5 }
  0x20   : > { %v422_v10 = vadd.f32 %v421_v9, %v420_v8 }
  0x22   : > { %v423_v11 = vrot.slane %v422_v10, 2 }
  0x23   : > { %416 = vadd.xlane.f32.xlu0 %v415_v6 }
  0x24   : > { %v424_v12 = vadd.f32 %v423_v11, %v422_v10 }
  0x26   : > { %v425_v14 = vrot.slane %v424_v12, 1 }
  0x28   : > { %v426_v15 = vadd.f32 %v425_v14, %v424_v12 }
  0xac   : > { %v414_v13 = vpop.xlane.xlu0 %413 }
  0xad   : > { %v512_v18 = vadd.f32 %v426_v15, %v414_v13 }
  0xb0   : > { %v417_v16 = vpop.xlane.xlu0 %416 }
  0xb1   : > { %v513_v17 = vadd.f32 %v426_v15, %v417_v16 }
  0xf0   : > { %v1122_v19 = vpop.f32.mrb[0].mxu0 }
  0xf1   : > { %v515_v20 = vmul.f32 2.0, %v1122_v19  ;;  %v503_v21 = vpop.f32.mrb[1].mxu0 }
  0xf2   : > { %v514_v23 = vmul.f32 2.0, %v503_v21 }
  0xf3   : > { %v517_v24 = vsub.f32 %v513_v17, %v515_v20 }
  0xf4   : > { %v516_v25 = vsub.f32 %v512_v18, %v514_v23 }
  0xf5   : > { %v519_v26 = vmax.f32 %v517_v24, 0.0 }
  0xf6   : > { %v518_v28 = vmax.f32 %v516_v25, 0.0 }
  0xf7   : > { %v525_v29 = vand.u32 4294967288, %v519_v26 }
  0xf8   : > { %v524_v30 = vand.u32 4294967288, %v518_v28 }
  0xf9   : > { %v527_v31 = vor.u32 %v525_v29, %v1443_v27 }
  0xfa   : > { %v526_v32 = vor.u32 %v524_v30, %v1443_v27 }
  0xfb   : > { %v544_v34 = vsel %vm528_vm3, %v527_v31, 2147483647 }
  0xfc   : > { %v529_v33 = vsel %vm528_vm3, %v526_v32, 2147483647  ;;  %v546_v37 = vshra.s32 %v544_v34, 16  ;;  %v545_v42 = vand.u32 65535, %v544_v34 }
  0xfd   : > { %v531_v35 = vshra.s32 %v529_v33, 16  ;;  %v530_v39 = vand.u32 65535, %v529_v33 }
  0xfe   : > { %v548_v38 = vcvt.s32.f32 %v546_v37  ;;  %v547_v45 = vcvt.s32.f32 %v545_v42 }
  0xff   : > { %v533_v36 = vcvt.s32.f32 %v531_v35  ;;  %v532_v41 = vcvt.s32.f32 %v530_v39 }
 0x101   : > { %534 = vmin.xlane.f32.xlu1 %v533_v36 }
 0x105   : > { %549 = vmin.xlane.f32.xlu1 %v548_v38 }
 0x18e   : > { %v535_v40 = vpop.xlane.xlu1 %534 }
 0x18f   : > { %vm536_vm4 = vcmp.eq.f32.partialorder %v533_v36, %v535_v40  ;;  %v541_v48 = vcvt.f32.s32 %v535_v40 }
 0x190   : > { %v537_v43 = vsel %vm536_vm4, %v532_v41, inf }
 0x191   : > { %538 = vmin.xlane.f32.xlu0 %v537_v43  ;;  %v542_v50 = vshll.u32 %v541_v48, 16 }
 0x192   : > { %v550_v44 = vpop.xlane.xlu1 %549 }
 0x193   : > { %vm551_vm5 = vcmp.eq.f32.partialorder %v548_v38, %v550_v44  ;;  %v556_v51 = vcvt.f32.s32 %v550_v44 }
 0x194   : > { %v552_v46 = vsel %vm551_vm5, %v547_v45, inf }
 0x195   : > { %553 = vmin.xlane.f32.xlu1 %v552_v46  ;;  %v557_v55 = vshll.u32 %v556_v51, 16 }
 0x21e   : > { %v539_v49 = vpop.xlane.xlu0 %538 }
 0x21f   : > { %v540_v52 = vcvt.f32.s32 %v539_v49 }
 0x221   : > { %v543_v53 = vadd.s32 %v542_v50, %v540_v52 }
 0x222   : > { %v554_v54 = vpop.xlane.xlu1 %553 }
 0x223   : > { %v559_v56 = vand.u32 7, %v543_v53  ;;  %v561_v57 = vand.u32 4294967288, %v543_v53  ;;  %v555_v58 = vcvt.f32.s32 %v554_v54 }
 0x225   : > { %v565_v59 = vmax.f32 %v561_v57, 1e-16  ;;  %v558_v60 = vadd.s32 %v557_v55, %v555_v58  ;;  %vm1452_vm6 = vcmp.eq.s32.totalorder %v1443_v27, %v559_v56 }
 0x226   : > { %v581_v62 = vsel %vm1452_vm6, 2130706432, %v526_v32  ;;  %v1076_v10 = vsel %vm1452_vm6, 1.0, %v1318_v47 }
 0x227   : > { %1222 = vrcp.f32 %v565_v59  ;;  %v560_v63 = vand.u32 7, %v558_v60  ;;  %v562_v0 = vand.u32 4294967288, %v558_v60  ;;  %v583_v1 = vsel %vm528_vm3, %v581_v62, 2147483647 }
 0x228   : > { %v585_v2 = vshra.s32 %v583_v1, 16  ;;  %v584_v15 = vand.u32 65535, %v583_v1 }
 0x229   : > { %v566_v3 = vmax.f32 %v562_v0, 1e-16  ;;  %vm570_vm7 = vcmp.eq.s32.totalorder %v1443_v27, %v560_v63 }
 0x22a   : > { %v587_v4 = vcvt.s32.f32 %v585_v2  ;;  %v582_v5 = vsel %vm570_vm7, 2130706432, %v527_v31  ;;  %v1077_v13 = vsel %vm570_vm7, 1.0, %v1318_v47  ;;  %v586_v17 = vcvt.s32.f32 %v584_v15  ;;  %v1218_v15 = vld [vmem:[%s1611_s6 + $0x20] sm:$0xff]  }
 0x22b   : > { %1224 = vrcp.f32 %v566_v3  ;;  %v598_v6 = vsel %vm528_vm3, %v582_v5, 2147483647 }
 0x22c   : > { %588 = vmin.xlane.f32.xlu0 %v587_v4  ;;  %v600_v7 = vshra.s32 %v598_v6, 16  ;;  %v599_v18 = vand.u32 65535, %v598_v6  ;;  %v698_v6 = vld [vmem:[%s1609_s4] sm:$0x3] }
 0x22e   : > { %v602_v8 = vcvt.s32.f32 %v600_v7  ;;  %v601_v21 = vcvt.s32.f32 %v599_v18 }
 0x230   : > { %603 = vmin.xlane.f32.xlu1 %v602_v8 }
 0x231   : > { %v1223_v9 = vpop.eup %1222 }
 0x232   : > { %v575_v11 = vmul.f32 %v1223_v9, %v1076_v10 }
 0x235   : > { %v1225_v12 = vpop.eup %1224 }
 0x236   : > { %v576_v14 = vmul.f32 %v1225_v12, %v1077_v13  ;;  %v1216_v13 = vld [vmem:[%s1611_s6 + $0x10] sm:$0xff]  }
 0x2b9   : > { %v589_v16 = vpop.xlane.xlu0 %588 }
 0x2ba   : > { %vm590_vm8 = vcmp.eq.f32.partialorder %v587_v4, %v589_v16  ;;  %v595_v23 = vcvt.f32.s32 %v589_v16  ;;  %v695_v4 = vld [vmem:[%s394_s16] sm:$0xff] }
 0x2bb   : > { %v591_v19 = vsel %vm590_vm8, %v586_v17, inf }
 0x2bc   : > { %592 = vmin.xlane.f32.xlu0 %v591_v19  ;;  %v596_v25 = vshll.u32 %v595_v23, 16 }
 0x2bd   : > { %v604_v20 = vpop.xlane.xlu1 %603 }
 0x2be   : > { %vm605_vm9 = vcmp.eq.f32.partialorder %v602_v8, %v604_v20  ;;  %v610_v26 = vcvt.f32.s32 %v604_v20  ;;  %v705_v8 = vsel %vm703_vm14, %v698_v6, 0 }
 0x2bf   : > { %v606_v22 = vsel %vm605_vm9, %v601_v21, inf  ;;  %1124 = vmatpush3.bf16.msra.mxu0 %v705_v8 }
 0x2c0   : > { %607 = vmin.xlane.f32.xlu1 %v606_v22  ;;  %v611_v31 = vshll.u32 %v610_v26, 16  ;;  %1129 = vmatprep.subr.bf16.mxu0 %v1318_v47 }
 0x349   : > { %v593_v24 = vpop.xlane.xlu0 %592 }
 0x34a   : > { %v594_v28 = vcvt.f32.s32 %v593_v24 }
 0x34c   : > { %v597_v29 = vadd.s32 %v596_v25, %v594_v28 }
 0x34d   : > { %v608_v30 = vpop.xlane.xlu1 %607 }
 0x34e   : > { %v613_v32 = vand.u32 7, %v597_v29  ;;  %v615_v33 = vand.u32 4294967288, %v597_v29  ;;  %v609_v34 = vcvt.f32.s32 %v608_v30 }
 0x350   : > { %v619_v35 = vmax.f32 %v615_v33, 1e-16  ;;  %v612_v36 = vadd.s32 %v611_v31, %v609_v34  ;;  %vm1466_vm10 = vcmp.eq.s32.totalorder %v1443_v27, %v613_v32 }
 0x351   : > { %v635_v38 = vsel %vm1466_vm10, 2130706432, %v581_v62  ;;  %v1078_v51 = vsel %vm1466_vm10, 1.0, %v1318_v47 }
 0x352   : > { %1226 = vrcp.f32 %v619_v35  ;;  %v614_v39 = vand.u32 7, %v612_v36  ;;  %v616_v40 = vand.u32 4294967288, %v612_v36  ;;  %v637_v41 = vsel %vm528_vm3, %v635_v38, 2147483647 }
 0x353   : > { %v639_v42 = vshra.s32 %v637_v41, 16  ;;  %v638_v60 = vand.u32 65535, %v637_v41 }
 0x354   : > { %v620_v43 = vmax.f32 %v616_v40, 1e-16  ;;  %vm624_vm11 = vcmp.eq.s32.totalorder %v1443_v27, %v614_v39 }
 0x355   : > { %v641_v44 = vcvt.s32.f32 %v639_v42  ;;  %v636_v45 = vsel %vm624_vm11, 2130706432, %v582_v5  ;;  %v1079_v56 = vsel %vm624_vm11, 1.0, %v1318_v47  ;;  %v640_v62 = vcvt.s32.f32 %v638_v60  ;;  %v696_v5 = vld [vmem:[%s394_s16 + $0x8] sm:$0xff]  ;;  %s373_s16 = sand.u32 1, %s1300_s28  }
 0x356   : > { %1228 = vrcp.f32 %v620_v43  ;;  %v652_v46 = vsel %vm528_vm3, %v636_v45, 2147483647  ;;  %v697_v7 = vpack.c.bf16 %v696_v5, %v695_v4  ;;  %s1066_s22 = sshll.u32 %s373_s16, 4  ;;  %s1559_s19 = scalar_lea.sflag [#allocation3], %s373_s16 }
 0x357   : > { %642 = vmin.xlane.f32.xlu0 %v641_v44  ;;  %v654_v48 = vshra.s32 %v652_v46, 16  ;;  %v653_v63 = vand.u32 65535, %v652_v46  ;;  %s375_s24 = scalar_lea.vmem [#allocation2], %s1066_s22  ;;  %s1242_s22 = sshll.u32 %s1320_s20, 4  ;;  %s1243_s22 = int_to_ptr.vmem [resolvable:$false] %s1242_s22 }
 0x358   : > { %1126 = vmatmul.mubr.msk.bf16.vlgmr.msra.gmra.mrb[4].mxu0 %vm699_vm0, %v697_v7  ;;  %s1244_s23 = scalar_lea.vmem %s1243_s22, 512 }
 0x359   : > { %v656_v49 = vcvt.s32.f32 %v654_v48  ;;  %v655_v2 = vcvt.s32.f32 %v653_v63  ;;  %1131 = vmatprep.mubr.msk.bf16.mxu0 %vm1319_vm15, %v1318_v47 }
 0x35b   : > { %657 = vmin.xlane.f32.xlu1 %v656_v49 }
 0x35c   : > { %v1227_v50 = vpop.eup %1226 }
 0x35d   : > { %v1478_v52 = vadd.f32 %v1227_v50, %v1223_v9  ;;  %v629_v53 = vmul.f32 %v1227_v50, %v1078_v51  ;;  %v694_v9 = vld [vmem:[%s403_s25] sm:$0xf]  ;;  %s940_s25 = sshll.u32 %s375_s24, 4  ;;  %s1552_s25 = int_to_ptr.vmem [resolvable:$true] %s940_s25 }
 0x35e   : > { %v753_v10 = vsel %vm751_vm1, %v694_v9, 0  ;;  %s1238_s30 = scalar_lea.vmem %s1552_s25, 256  ;;  %p1245_p1 = scmp.lt.s32.totalorder %s1552_s25, %s1243_s22 }
 0x35f   : > { %v1480_v54 = vadd.f32 %v629_v53, %v575_v11  ;;  %1130 = vmatpush3.bf16.msra.mxu0 %v753_v10  ;;  %v1214_v11 = vld [vmem:[%s1611_s6] sm:$0xff]   ;;  %v1220_v53 = vld [vmem:[%s1611_s6 + $0x30] sm:$0xff]   ;;  %p1239_p12 = scmp.ne.s32.totalorder %s1552_s25, %s1238_s30  ;;  %p1246_p2 = scmp.lt.s32.totalorder %s1244_s23, %s1238_s30 }
 0x360   : > { %v1229_v55 = vpop.eup %1228  ;;  %1136 = vmatpush3.bf16.msra.mxu1 %v1214_v11 }
 0x361   : > { %v1483_v57 = vadd.f32 %v1229_v55, %v1225_v12  ;;  %v630_v58 = vmul.f32 %v1229_v55, %v1079_v56  ;;  %v1215_v12 = vld [vmem:[%s1611_s6 + $0x8] sm:$0xff]   ;;  %1137 = vmatprep.subr.bf16.mxu1 %v1318_v47  ;;  %v1084_v56 = vld [vmem:[%s1610_s5] ss:$0 sm:$0xff]  ;;  %p1240_p13 = pnand %p1239_p12, %p1408_p4  ;;  %p1247_p3 = por %p1246_p2, %p1245_p1 }
 0x363   : > { %v1485_v59 = vadd.f32 %v630_v58, %v576_v14  ;;  %v1217_v14 = vld [vmem:[%s1611_s6 + $0x18] sm:$0xff]   ;;  %p1241_p0 = pneg %p1240_p13 }
 0x364   : > { %1138 = vmatpush3.bf16.msra.mxu1 %v1215_v12 }
 0x365   : > { %1139 = vmatprep.subr.bf16.mxu1 %v1318_v47  ;;  %p1248_p5 = pnand %p1247_p3, %p1241_p0 }
 0x368   : > { %1140 = vmatpush3.bf16.msra.mxu1 %v1216_v13 }
 0x369   : > { %1141 = vmatprep.subr.bf16.mxu1 %v1318_v47 }
 0x36c   : > { %1142 = vmatpush3.bf16.msra.mxu1 %v1217_v14 }
 0x36d   : > { %1143 = vmatprep.subr.bf16.mxu1 %v1318_v47 }
 0x370   : > { %1144 = vmatpush3.bf16.msra.mxu1 %v1218_v15 }
 0x371   : > { %1145 = vmatprep.subr.bf16.mxu1 %v1318_v47 }
 0x3e4   : > { %v643_v61 = vpop.xlane.xlu0 %642 }
 0x3e5   : > { %vm644_vm12 = vcmp.eq.f32.partialorder %v641_v44, %v643_v61  ;;  %v649_v16 = vcvt.f32.s32 %v643_v61 }
 0x3e6   : > { %v645_v0 = vsel %vm644_vm12, %v640_v62, inf }
 0x3e7   : > { %646 = vmin.xlane.f32.xlu0 %v645_v0  ;;  %v650_v18 = vshll.u32 %v649_v16, 16 }
 0x3e8   : > { %v658_v1 = vpop.xlane.xlu1 %657 }
 0x3e9   : > { %vm659_vm13 = vcmp.eq.f32.partialorder %v656_v49, %v658_v1  ;;  %v664_v19 = vcvt.f32.s32 %v658_v1 }
 0x3ea   : > { %v660_v3 = vsel %vm659_vm13, %v655_v2, inf  ;;  %v1085_v2 = vld [vmem:[%s1612_s7] ss:$0 sm:$0xff] }
 0x3eb   : > { %661 = vmin.xlane.f32.xlu1 %v660_v3  ;;  %v665_v23 = vshll.u32 %v664_v19, 16 }
 0x42b   : > { %v741_v49 = vpop.f32.mrb[4].mxu0 }
 0x42c   : > { %v1127_v50 = vpop.f32.mrb[5].mxu0 }
 0x42d   : > { %v744_v51 = vpop.f32.mrb[6].mxu0 }
 0x474   : > { %v647_v17 = vpop.xlane.xlu0 %646 }
 0x475   : > { %v648_v20 = vcvt.f32.s32 %v647_v17 }
 0x477   : > { %v651_v21 = vadd.s32 %v650_v18, %v648_v20 }
 0x478   : > { %v662_v22 = vpop.xlane.xlu1 %661 }
 0x479   : > { %v669_v24 = vand.u32 4294967288, %v651_v21  ;;  %v663_v25 = vcvt.f32.s32 %v662_v22  ;;  %v667_v32 = vand.u32 7, %v651_v21 }
 0x47b   : > { %v673_v26 = vmax.f32 %v669_v24, 1e-16  ;;  %v666_v28 = vadd.s32 %v665_v23, %v663_v25  ;;  %vm677_vm2 = vcmp.eq.s32.totalorder %v1443_v27, %v667_v32 }
 0x47c   : > { %v1080_v37 = vsel %vm677_vm2, 1.0, %v1318_v47 }
 0x47d   : > { %1230 = vrcp.f32 %v673_v26  ;;  %v670_v29 = vand.u32 4294967288, %v666_v28  ;;  %v668_v35 = vand.u32 7, %v666_v28 }
 0x47f   : > { %v674_v30 = vmax.f32 %v670_v29, 1e-16  ;;  %vm678_vm4 = vcmp.eq.s32.totalorder %v1443_v27, %v668_v35  ;;  %v1219_v27 = vld [vmem:[%s1611_s6 + $0x28] sm:$0xff]  }
 0x480   : > { %v1081_v39 = vsel %vm678_vm4, 1.0, %v1318_v47  ;;  %1146 = vmatpush3.bf16.msra.mxu1 %v1219_v27 }
 0x481   : > { %1232 = vrcp.f32 %v674_v30  ;;  %1147 = vmatprep.subr.bf16.mxu1 %v1318_v47 }
 0x484   : > { %1148 = vmatpush3.bf16.msra.mxu1 %v1220_v53 }
 0x485   : > { %1149 = vmatprep.subr.bf16.mxu1 %v1318_v47 }
 0x487   : > { %v1231_v31 = vpop.eup %1230 }
 0x488   : > { %v687_v33 = vadd.f32 %v1231_v31, %v1478_v52  ;;  %v683_v38 = vmul.f32 %v1231_v31, %v1080_v37  ;;  %v1128_v52 = vpop.f32.mrb[7].mxu0 }
 0x48a   : > { %1234 = vrcp.f32 %v687_v33  ;;  %v685_v40 = vadd.f32 %v683_v38, %v1480_v54  ;;  %v1221_v54 = vld [vmem:[%s1611_s6 + $0x38] sm:$0xff]  }
 0x48b   : > { %v1233_v34 = vpop.eup %1232  ;;  %1150 = vmatpush3.bf16.msra.mxu1 %v1221_v54 }
 0x48c   : > { %v688_v36 = vadd.f32 %v1233_v34, %v1483_v57  ;;  %v684_v41 = vmul.f32 %v1233_v34, %v1081_v39 }
 0x48e   : > { %1236 = vrcp.f32 %v688_v36  ;;  %v686_v44 = vadd.f32 %v684_v41, %v1485_v59 }
 0x494   : > { %v1235_v42 = vpop.eup %1234 }
 0x495   : > { %v691_v43 = vmul.f32 %v1235_v42, %v685_v40 }
 0x498   : > { %v1237_v45 = vpop.eup %1236 }
 0x499   : > { %v692_v46 = vmul.f32 %v1237_v45, %v686_v44 }
 0x49b   : > { %v693_v48 = vpack.c.bf16 %v692_v46, %v691_v43 }
 0x49d   : > { %1132 = vmatmul.mubr.msk.bf16.vlgmr.msra.gmra.mrb[8].mxu0 %vm528_vm3, %v693_v48 }
 0x570   : > { %v789_v55 = vpop.f32.mrb[8].mxu0 }
 0x571   : > { %v790_v57 = vadd.f32 %v789_v55, %v741_v49  ;;  %v1133_v58 = vpop.f32.mrb[9].mxu0 }
 0x572   : > { %v792_v59 = vpop.f32.mrb[10].mxu0 }
 0x573   : > { %v803_v60 = vadd.f32 %v1084_v56, %v790_v57  ;;  %v793_v61 = vadd.f32 %v792_v59, %v744_v51  ;;  %v1134_v62 = vpop.f32.mrb[11].mxu0 }
 0x575   : > { %v804_v63 = vadd.f32 %v1084_v56, %v793_v61  ;;  %v805_v47 = vmax.f32 %v803_v60, 0.0 }
 0x577   : > { %v806_v0 = vmax.f32 %v804_v63, 0.0 }
 0x579   : > { %v807_v1 = vpack.c.bf16 %v806_v0, %v805_v47 }
 0x57b   : > { %1152 = vmatmul.mubr.bf16.vlgmr.msra.gmra.mrb[0].mxu1 %v807_v1 }
 0x64e   : > { %v913_v3 = vpop.f32.mrb[0].mxu1 }
 0x64f   : > { %v914_v4 = vadd.f32 %v1085_v2, %v913_v3  ;;  %v1153_v5 = vpop.f32.mrb[1].mxu1 }
 0x650   : > { %v916_v6 = vpop.f32.mrb[2].mxu1 }
 0x651   : > { %v920_v7 = vmax.f32 %v914_v4, 0.0  ;;  %v917_v8 = vadd.f32 %v1085_v2, %v916_v6  ;;  %v1154_v9 = vpop.f32.mrb[3].mxu1 }
 0x653   : > { %922 = vst [vmem:[%s375_s24] sm:$0xff] %v920_v7  ;;  %v921_v10 = vmax.f32 %v917_v8, 0.0 }
 0x655   : > { %923 = vst [vmem:[%s375_s24 + $0x8] sm:$0xff] %v921_v10 }
 0x656   : > { %1251 = shalt.err (!%p1248_p5)
}
 0x657   : > { %s1252_s16 = scalar_lea.hbm %s1557_s14, 256  ;;  %s1256_s26 = scalar_lea.hbm %s1613_s8, 512 }
 0x658   : > { %p1253_p6 = scmp.ne.s32.totalorder %s1557_s14, %s1252_s16  ;;  %p1257_p10 = scmp.lt.u32.totalorder %s1557_s14, %s1613_s8 }
 0x659   : > { %p1258_p11 = scmp.lt.u32.totalorder %s1256_s26, %s1252_s16  ;;  %p1260_p13 = scmp.lt.u32.totalorder %s1252_s16, %s1557_s14 }
 0x65a   : > { %p1254_p7 = pnand %p1253_p6, %p1408_p4 }
 0x65b   : > { %p1259_p12 = por %p1258_p11, %p1257_p10 }
 0x65c   : > { %p1255_p9 = pneg %p1254_p7 }
 0x65d   : > { %p1261_p0 = por %p1260_p13, %p1259_p12 }
 0x65f   : > { %p1262_p1 = pnand %p1261_p0, %p1255_p9 }
 0x661   : > { %1265 = shalt.err (!%p1262_p1)
}
 0x662   : > { %s1321_s30 = smov 128   ;;  %s1322_s20 = smov 8  }
 0x663   : > { %1155 = dma.vmem_to_hbm [thread:$0]  (%p1408_p4), %s1552_s25, 256, %s1557_s14, %s1559_s19, %s1321_s30, %s1321_s30, %s1322_s20  }
 0x664 PF: > { %p1161_p2 = scmp.ge.s32.totalorder %s1316_s10, 2  ;;  %s955_s22 = sand.u32 1, %s1296_s27  }
 0x665   : > { %s956_s23 = scalar_lea.sflag [#allocation3], %s955_s22 }
 0x666   : > { %p1158_p3 = pnand %p1161_p2, %p1415_p8 }
 0x668   : > { %1291 = dma.done.wait (!%p1158_p3), %s956_s23, 256  }
 0x669   : > { %1293 = vsyncadd (!%p1158_p3), %s956_s23, 4294967040  ;;  %s21_s10 = sadd.s32 1, %s1316_s10   ;;  %s1620_s27 = smov %s1300_s28 }
 0x66a   : > { %p18_p5 = scmp.ge.s32.totalorder %s21_s10, 4   ;;  %s1621_s28 = smov %s1304_s29 }
 0x66b   : > { %s1622_s29 = smov %s1421_s18  ;;  %s1623_s30 = smov %s1312_s9 }
 0x66c   : > { %s1624_s9 = smov %s1626_s13  ;;  %20 = sbr.rel (!%p18_p5) target bundleno = 4 (0x4), region = 96 }
 0x673   :  { %961 = vsyncpa [#allocation3], 1 }
 0x674   :  { %963 = vsyncpa [#allocation3 + $0x1], 1 }

</bundles_post_ra>
